<compile_context>
chip_gen: v5e
topology: v5e:2x2
jax: 0.10.0
libtpu: 0.0.40
codegen_flags: <defaults>
</compile_context>

<pallas_src>
import jax
import jax.numpy as jnp
from jax import lax
from jax.experimental import pallas as pl
from jax.experimental.pallas import tpu as pltpu

# ----------------------------- problem sizes -----------------------------
B = 2         # batch
BP = 8        # batch padded to one sublane tile
S = 8         # sentence length (MAX_VQA_LENGTH stand-in)
O = 8         # number of visual objects
F = 64        # visual feature size
H = 32        # hid_dim (lxrt_encoder.dim stand-in)
A = 16        # num_answers
VOCAB = 64    # toy vocab for the token-embedding glue
FP = F + 4    # fused feat||pos feature width
SLAB = 128    # lane-dense packed output width (A + 3*H = 112 -> pad to 128)


# =========================================================================
# Fused kernel: encoder stand-in + pooler + logit_fc head, one launch.
#
#   visn   = (feat||pos) @ W_visn + b_visn          (BP*O, H) -> (BP, O, H)
#   v_cls  = mean_o(visn)                           (BP, H)
#   l_cls  = lang CLS embedding (input)             (BP, H)
#   x      = tanh((l_cls + v_cls) @ Wpool + bpool)  (BP, H)
#   h      = GeLU(x @ W1 + b1)            (exact erf GeLU, LXMERT-style)
#   hn     = BertLayerNorm(h, eps=1e-12)  (single-pass mean / E[x^2]-E[x]^2)
#   logits = hn @ W2 + b2                           (BP, A)
#
#   row-param slab (8, 2H): row0=b_visn[:H] row1=bpool[:H] row2=b1 row3=gamma
#                           row4=beta row5=b2[:A]
#   out slab (BP, 128) lanes: [0:A)=logits [A:A+H)=v_cls [A+H:A+2H)=l_cls
#                             [A+2H:A+3H)=x  rest zero
# =========================================================================
def _vqa_fused_kernel(lcls_ref, fp_ref, w_visn_ref, wpool_ref, w1_ref, w2_ref,
                      rowp_ref, out_ref):
    bf16 = jnp.bfloat16
    f32 = jnp.float32

    # unpack the row-vector params (static slices of one VMEM tile)
    rp = rowp_ref[...]                         # (8, 2H) f32
    b_visn = rp[0:1, 0:H]
    bpool = rp[1:2, 0:H]
    b1 = rp[2:3, :]
    gamma = rp[3:4, :]
    beta = rp[4:5, :]
    b2 = rp[5:6, 0:A]

    # --- visual projection: one 2-D MXU matmul over (BP*O, F+4) ---
    visn = jnp.dot(fp_ref[...].astype(bf16), w_visn_ref[...],
                   preferred_element_type=f32) + b_visn          # (BP*O, H)
    visn = visn.reshape(BP, O, H)
    v_cls = jnp.mean(visn, axis=1)                               # (BP, H)
    l_cls = lcls_ref[...]                                        # (BP, H)

    # --- pooler ---
    pooled = jnp.dot((l_cls + v_cls).astype(bf16), wpool_ref[...],
                     preferred_element_type=f32) + bpool
    x = jnp.tanh(pooled)                                         # (BP, H)

    # --- logit_fc: Linear -> GeLU(erf) -> BertLayerNorm(eps=1e-12) -> Linear ---
    h = jnp.dot(x.astype(bf16), w1_ref[...],
                preferred_element_type=f32) + b1                 # (BP, 2H)

    # exact GeLU: x * 0.5 * (1 + erf(x / sqrt(2)))
    h = h * 0.5 * (1.0 + lax.erf(h * 0.7071067811865475))

    # single-pass LayerNorm (E[x^2] - E[x]^2), rsqrt on the EUP
    u = jnp.mean(h, axis=-1, keepdims=True)
    usq = jnp.mean(h * h, axis=-1, keepdims=True)
    var = usq - u * u
    hn = (h - u) * lax.rsqrt(var + 1e-12)
    hn = hn * gamma + beta

    logits = jnp.dot(hn.astype(bf16), w2_ref[...],
                     preferred_element_type=f32) + b2            # (BP, A)

    # --- one lane-dense (8, 128) store instead of 4 masked sub-128 stores ---
    pad = jnp.zeros((BP, SLAB - (A + 3 * H)), f32)
    out_ref[...] = jnp.concatenate([logits, v_cls, l_cls, x, pad], axis=-1)


def vqa_fused_call(l_cls_p, fp_p, params):
    vmem = pl.BlockSpec(memory_space=pltpu.MemorySpace.VMEM)
    return pl.pallas_call(
        _vqa_fused_kernel,
        out_shape=jax.ShapeDtypeStruct((BP, SLAB), jnp.float32),
        in_specs=[vmem] * 7,
        out_specs=vmem,
    )(l_cls_p, fp_p,
      params['w_visn'], params['wpool'], params['w1'], params['w2'],
      params['row_params'])


# =========================================================================
# Parameter init (deterministic, BERT-style: N(0, 0.02) weights, zero bias,
# LayerNorm gamma=1 / beta=0) and the forward wrapper.
# =========================================================================
def init_params(key):
    ks = jax.random.split(key, 8)
    bf16 = jnp.bfloat16
    p = {}
    p['tok_emb'] = 0.02 * jax.random.normal(ks[0], (VOCAB, H), jnp.float32)
    # encoder stand-in: fused visual weight = [Wv (F,H) ; Wp (4,H)] -> (F+4, H)
    p['w_visn'] = (0.02 * jax.random.normal(ks[1], (FP, H), jnp.float32)).astype(bf16)
    p['wpool'] = (0.02 * jax.random.normal(ks[2], (H, H), jnp.float32)).astype(bf16)
    # logit_fc: Linear(H, 2H) -> GeLU -> LayerNorm(2H) -> Linear(2H, A)
    p['w1'] = (0.02 * jax.random.normal(ks[3], (H, 2 * H), jnp.float32)).astype(bf16)
    p['w2'] = (0.02 * jax.random.normal(ks[4], (2 * H, A), jnp.float32)).astype(bf16)

    # pack the six row-vector params into one (8, 2H) lane/sublane-dense slab
    b_visn = jnp.zeros((H,), jnp.float32)
    bpool = jnp.zeros((H,), jnp.float32)
    b1 = jnp.zeros((2 * H,), jnp.float32)
    gamma = jnp.ones((2 * H,), jnp.float32)
    beta = jnp.zeros((2 * H,), jnp.float32)
    b2 = jnp.zeros((A,), jnp.float32)
    rowp = jnp.zeros((8, 2 * H), jnp.float32)
    rowp = rowp.at[0, 0:H].set(b_visn)
    rowp = rowp.at[1, 0:H].set(bpool)
    rowp = rowp.at[2, :].set(b1)
    rowp = rowp.at[3, :].set(gamma)
    rowp = rowp.at[4, :].set(beta)
    rowp = rowp.at[5, 0:A].set(b2)
    p['row_params'] = rowp
    return p


@jax.jit
def vqa_forward(feat, pos, sent_ids, params):
    """Mirrors VQAModel.forward: returns dict with logits / vis_feat / lang_feat / feat."""
    # glue: token-id embedding lookup (stands in for the string tokenizer+embeddings)
    lang_emb = jnp.take(params['tok_emb'], sent_ids, axis=0)           # (B, S, H)
    l_cls = lang_emb[:, 0, :]                                          # (B, H) CLS token

    # pad batch to one sublane tile (BP=8) and fuse feat||pos for one 2-D matmul
    l_cls_p = jnp.zeros((BP, H), jnp.float32).at[:B].set(l_cls)
    fp = jnp.concatenate([feat, pos], axis=-1)                         # (B, O, F+4)
    fp_p = (jnp.zeros((BP, O, FP), jnp.float32).at[:B].set(fp)
            .reshape(BP * O, FP))                                      # (BP*O, F+4)

    slab = vqa_fused_call(l_cls_p, fp_p, params)                       # (BP, 128)

    out = {}
    out['logits'] = slab[:B, 0:A]                       # (B, A)
    out['vis_feat'] = slab[:B, A:A + H]                 # (B, H)
    out['lang_feat'] = slab[:B, A + H:A + 2 * H]        # (B, H)
    out['feat'] = slab[:B, A + 2 * H:A + 3 * H]         # (B, H)
    return out


if __name__ == "__main__":
    key = jax.random.PRNGKey(0)
    kp, kf, kpos, ks = jax.random.split(key, 4)

    params = init_params(kp)
    feat = jax.random.normal(kf, (B, O, F), jnp.float32)        # (b, o, f)
    pos = jax.random.uniform(kpos, (B, O, 4), jnp.float32)      # (b, o, 4)
    sent_ids = jax.random.randint(ks, (B, S), 0, VOCAB)         # token-id stand-in for sent

    out = vqa_forward(feat, pos, sent_ids, params)
    jax.block_until_ready(out)

    assert out['logits'].shape == (B, A)
    assert out['vis_feat'].shape == (B, H)
    assert out['lang_feat'].shape == (B, H)
    assert out['feat'].shape == (B, H)
    assert all(bool(jnp.all(jnp.isfinite(v))) for v in out.values())
    print("KERNEL_OK")
</pallas_src>

<mosaic_0001>
module attributes {stable_mosaic.version = 11 : i64} {
  func.func @_vqa_fused_kernel(%arg0: memref<8x32xf32, #tpu.memory_space<vmem>>, %arg1: memref<64x68xf32, #tpu.memory_space<vmem>>, %arg2: memref<68x32xbf16, #tpu.memory_space<vmem>>, %arg3: memref<32x32xbf16, #tpu.memory_space<vmem>>, %arg4: memref<32x64xbf16, #tpu.memory_space<vmem>>, %arg5: memref<64x16xbf16, #tpu.memory_space<vmem>>, %arg6: memref<8x64xf32, #tpu.memory_space<vmem>>, %arg7: memref<8x128xf32, #tpu.memory_space<vmem>>) attributes {dimension_semantics = [], scalar_prefetch = 0 : i64, scratch_operands = 0 : i64, tpu.core_type = #tpu.core_type<tc>} {
    %c0 = arith.constant 0 : index
    %c0_0 = arith.constant 0 : index
    %0 = vector.load %arg6[%c0, %c0_0] : memref<8x64xf32, #tpu.memory_space<vmem>>, vector<8x64xf32>
    %1 = vector.extract_strided_slice %0 {offsets = [0, 0], sizes = [1, 32], strides = [1, 1]} : vector<8x64xf32> to vector<1x32xf32>
    %2 = vector.extract_strided_slice %0 {offsets = [1, 0], sizes = [1, 32], strides = [1, 1]} : vector<8x64xf32> to vector<1x32xf32>
    %3 = vector.extract_strided_slice %0 {offsets = [2, 0], sizes = [1, 64], strides = [1, 1]} : vector<8x64xf32> to vector<1x64xf32>
    %4 = vector.extract_strided_slice %0 {offsets = [3, 0], sizes = [1, 64], strides = [1, 1]} : vector<8x64xf32> to vector<1x64xf32>
    %5 = vector.extract_strided_slice %0 {offsets = [4, 0], sizes = [1, 64], strides = [1, 1]} : vector<8x64xf32> to vector<1x64xf32>
    %6 = vector.extract_strided_slice %0 {offsets = [5, 0], sizes = [1, 16], strides = [1, 1]} : vector<8x64xf32> to vector<1x16xf32>
    %c0_1 = arith.constant 0 : index
    %c0_2 = arith.constant 0 : index
    %7 = vector.load %arg1[%c0_1, %c0_2] : memref<64x68xf32, #tpu.memory_space<vmem>>, vector<64x68xf32>
    %8 = arith.truncf %7 : vector<64x68xf32> to vector<64x68xbf16>
    %c0_3 = arith.constant 0 : index
    %c0_4 = arith.constant 0 : index
    %9 = vector.load %arg2[%c0_3, %c0_4] : memref<68x32xbf16, #tpu.memory_space<vmem>>, vector<68x32xbf16>
    %cst = arith.constant dense<0.000000e+00> : vector<64x32xf32>
    %10 = tpu.matmul %8, %9, %cst {dimension_numbers = #tpu.dot_dimension_numbers<[1], [0], [0], [1], [0, 0, 1, 1], [], []>} : vector<64x68xbf16>, vector<68x32xbf16>, vector<64x32xf32> -> vector<64x32xf32>
    %11 = vector.broadcast %1 : vector<1x32xf32> to vector<64x32xf32>
    %12 = arith.addf %10, %11 : vector<64x32xf32>
    %13 = vector.shape_cast %12 : vector<64x32xf32> to vector<8x8x32xf32>
    %cst_5 = arith.constant dense<0.000000e+00> : vector<8x32xf32>
    %14 = vector.multi_reduction <add>, %13, %cst_5 [1] : vector<8x8x32xf32> to vector<8x32xf32>
    %cst_6 = arith.constant 8.000000e+00 : f32
    %15 = vector.broadcast %cst_6 : f32 to vector<8x32xf32>
    %16 = arith.divf %14, %15 : vector<8x32xf32>
    %c0_7 = arith.constant 0 : index
    %c0_8 = arith.constant 0 : index
    %17 = vector.load %arg0[%c0_7, %c0_8] : memref<8x32xf32, #tpu.memory_space<vmem>>, vector<8x32xf32>
    %18 = arith.addf %17, %16 : vector<8x32xf32>
    %19 = arith.truncf %18 : vector<8x32xf32> to vector<8x32xbf16>
    %c0_9 = arith.constant 0 : index
    %c0_10 = arith.constant 0 : index
    %20 = vector.load %arg3[%c0_9, %c0_10] : memref<32x32xbf16, #tpu.memory_space<vmem>>, vector<32x32xbf16>
    %cst_11 = arith.constant dense<0.000000e+00> : vector<8x32xf32>
    %21 = tpu.matmul %19, %20, %cst_11 {dimension_numbers = #tpu.dot_dimension_numbers<[1], [0], [0], [1], [0, 0, 1, 1], [], []>} : vector<8x32xbf16>, vector<32x32xbf16>, vector<8x32xf32> -> vector<8x32xf32>
    %22 = vector.broadcast %2 : vector<1x32xf32> to vector<8x32xf32>
    %23 = arith.addf %21, %22 : vector<8x32xf32>
    %24 = math.tanh %23 : vector<8x32xf32>
    %25 = arith.truncf %24 : vector<8x32xf32> to vector<8x32xbf16>
    %c0_12 = arith.constant 0 : index
    %c0_13 = arith.constant 0 : index
    %26 = vector.load %arg4[%c0_12, %c0_13] : memref<32x64xbf16, #tpu.memory_space<vmem>>, vector<32x64xbf16>
    %cst_14 = arith.constant dense<0.000000e+00> : vector<8x64xf32>
    %27 = tpu.matmul %25, %26, %cst_14 {dimension_numbers = #tpu.dot_dimension_numbers<[1], [0], [0], [1], [0, 0, 1, 1], [], []>} : vector<8x32xbf16>, vector<32x64xbf16>, vector<8x64xf32> -> vector<8x64xf32>
    %28 = vector.broadcast %3 : vector<1x64xf32> to vector<8x64xf32>
    %29 = arith.addf %27, %28 : vector<8x64xf32>
    %cst_15 = arith.constant 5.000000e-01 : f32
    %30 = vector.broadcast %cst_15 : f32 to vector<8x64xf32>
    %31 = arith.mulf %29, %30 : vector<8x64xf32>
    %cst_16 = arith.constant 0.707106769 : f32
    %32 = vector.broadcast %cst_16 : f32 to vector<8x64xf32>
    %33 = arith.mulf %29, %32 : vector<8x64xf32>
    %34 = math.erf %33 : vector<8x64xf32>
    %cst_17 = arith.constant 1.000000e+00 : f32
    %35 = vector.broadcast %cst_17 : f32 to vector<8x64xf32>
    %36 = arith.addf %35, %34 : vector<8x64xf32>
    %37 = arith.mulf %31, %36 : vector<8x64xf32>
    %cst_18 = arith.constant dense<0.000000e+00> : vector<8xf32>
    %38 = vector.multi_reduction <add>, %37, %cst_18 [1] : vector<8x64xf32> to vector<8xf32>
    %39 = vector.shape_cast %38 : vector<8xf32> to vector<8x1xf32>
    %cst_19 = arith.constant 6.400000e+01 : f32
    %40 = vector.broadcast %cst_19 : f32 to vector<8x1xf32>
    %41 = arith.divf %39, %40 : vector<8x1xf32>
    %42 = arith.mulf %37, %37 : vector<8x64xf32>
    %cst_20 = arith.constant dense<0.000000e+00> : vector<8xf32>
    %43 = vector.multi_reduction <add>, %42, %cst_20 [1] : vector<8x64xf32> to vector<8xf32>
    %44 = vector.shape_cast %43 : vector<8xf32> to vector<8x1xf32>
    %cst_21 = arith.constant 6.400000e+01 : f32
    %45 = vector.broadcast %cst_21 : f32 to vector<8x1xf32>
    %46 = arith.divf %44, %45 : vector<8x1xf32>
    %47 = arith.mulf %41, %41 : vector<8x1xf32>
    %48 = arith.subf %46, %47 : vector<8x1xf32>
    %49 = vector.broadcast %41 : vector<8x1xf32> to vector<8x64xf32>
    %50 = arith.subf %37, %49 : vector<8x64xf32>
    %cst_22 = arith.constant 9.99999996E-13 : f32
    %51 = vector.broadcast %cst_22 : f32 to vector<8x1xf32>
    %52 = arith.addf %48, %51 : vector<8x1xf32>
    %53 = math.rsqrt %52 : vector<8x1xf32>
    %54 = vector.broadcast %53 : vector<8x1xf32> to vector<8x64xf32>
    %55 = arith.mulf %50, %54 : vector<8x64xf32>
    %56 = vector.broadcast %4 : vector<1x64xf32> to vector<8x64xf32>
    %57 = arith.mulf %55, %56 : vector<8x64xf32>
    %58 = vector.broadcast %5 : vector<1x64xf32> to vector<8x64xf32>
    %59 = arith.addf %57, %58 : vector<8x64xf32>
    %60 = arith.truncf %59 : vector<8x64xf32> to vector<8x64xbf16>
    %c0_23 = arith.constant 0 : index
    %c0_24 = arith.constant 0 : index
    %61 = vector.load %arg5[%c0_23, %c0_24] : memref<64x16xbf16, #tpu.memory_space<vmem>>, vector<64x16xbf16>
    %cst_25 = arith.constant dense<0.000000e+00> : vector<8x16xf32>
    %62 = tpu.matmul %60, %61, %cst_25 {dimension_numbers = #tpu.dot_dimension_numbers<[1], [0], [0], [1], [0, 0, 1, 1], [], []>} : vector<8x64xbf16>, vector<64x16xbf16>, vector<8x16xf32> -> vector<8x16xf32>
    %63 = vector.broadcast %6 : vector<1x16xf32> to vector<8x16xf32>
    %64 = arith.addf %62, %63 : vector<8x16xf32>
    %cst_26 = arith.constant 0.000000e+00 : f32
    %65 = vector.broadcast %cst_26 : f32 to vector<8x16xf32>
    %66 = tpu.concatenate %64, %16, %17, %24, %65 in 1 : vector<8x16xf32>, vector<8x32xf32>, vector<8x32xf32>, vector<8x32xf32>, vector<8x16xf32> -> vector<8x128xf32>
    %c0_27 = arith.constant 0 : index
    %c0_28 = arith.constant 0 : index
    %67 = vector.load %arg7[%c0_27, %c0_28] : memref<8x128xf32, #tpu.memory_space<vmem>>, vector<8x128xf32>
    tpu.vector_store %arg7[%c0_27, %c0_28], %66 {strides = array<i32>} : memref<8x128xf32, #tpu.memory_space<vmem>>, vector<8x128xf32>,
    return
  }
}

</mosaic_0001>

<bundles_post_ra>
// kernel: vqa_forward.1
= control target key start
LH: loop header
LB: loop body
LE: loop exit
PB: predicated region body
PF: predicated region fallthrough
CT: control target
= control target key end

     0   :  { %vm90_vm0 = vcmask 1041408   ;;  %vm77_vm1 = vcmask 556032   ;;  %vm123_vm2 = vcmask 261120   ;;  %v536_v30 = vmov 8.0   ;;  %s537_s8 = smov 16   ;;  %s678_s2 = inlined_call_operand.vmem [shape: bf16[68,32], index: 2, kind: input, shape index: {}]   ;;  %s679_s1 = inlined_call_operand.vmem [shape: f32[64,68], index: 1, kind: input, shape index: {}]   ;;  %s680_s6 = inlined_call_operand.vmem [shape: f32[8,64], index: 6, kind: input, shape index: {}]   ;;  %s681_s3 = inlined_call_operand.vmem [shape: bf16[32,32], index: 3, kind: input, shape index: {}]   ;;  %s682_s0 = inlined_call_operand.vmem [shape: f32[8,32], index: 0, kind: input, shape index: {}]   ;;  %s683_s4 = inlined_call_operand.vmem [shape: bf16[32,64], index: 4, kind: input, shape index: {}]   ;;  %s684_s5 = inlined_call_operand.vmem [shape: bf16[64,16], index: 5, kind: input, shape index: {}]   ;;  %s685_s7 = inlined_call_operand.vmem [shape: f32[8,128], index: 7, kind: output, shape index: {}]  }
   0x1   :  { %v48_v0 = vld [vmem:[%s678_s2 + $0x20] sm:$0x3]  ;;  %v502_v4 = vld [vmem:[%s678_s2 + $0x18] sm:$0xff]  ;;  %v501_v5 = vld [vmem:[%s678_s2 + $0x10] sm:$0xff]  ;;  %526 = vrcp.f32 %v536_v30  ;;  %vm204_vm4 = vcmask 1041409   ;;  %vm206_vm5 = vcmask 1042434  }
   0x2   :  { %v67_v1 = vunpack.c.l.b16 %v48_v0  ;;  %v500_v6 = vld [vmem:[%s678_s2 + $0x8] sm:$0xff]  ;;  %v499_v7 = vld [vmem:[%s678_s2] sm:$0xff]  ;;  %v34_v10 = vld [vmem:[%s679_s1 + $0x30] sm:$0xff]  ;;  %vm208_vm6 = vcmask 1043459   ;;  %vm210_vm7 = vcmask 1044484   ;;  %vm212_vm8 = vcmask 1045509  }
   0x3   :  { %v28_v8 = vld [vmem:[%s679_s1] sm:$0xff]  ;;  %v29_v9 = vld [vmem:[%s679_s1 + $0x8] sm:$0xff]  ;;  %v35_v11 = vld [vmem:[%s679_s1 + $0x38] sm:$0xff]  ;;  %vm214_vm9 = vcmask 1046534   ;;  %vm216_vm10 = vcmask 1047559   ;;  %vm333_vm15 = vcmask 523264  }
   0x4   :  { %v72_v2 = vpack.c.b16 %v67_v1, %v67_v1  ;;  %v32_v12 = vld [vmem:[%s679_s1 + $0x20] sm:$0xff]  ;;  %v33_v13 = vld [vmem:[%s679_s1 + $0x28] sm:$0xff]  ;;  %v36_v14 = vpack.c.bf16 %v29_v9, %v28_v8  ;;  %v39_v15 = vpack.c.bf16 %v35_v11, %v34_v10  ;;  %v30_v17 = vld [vmem:[%s679_s1 + $0x10] sm:$0xff] }
   0x5   :  { %v38_v16 = vpack.c.bf16 %v33_v13, %v32_v12  ;;  %v31_v18 = vld [vmem:[%s679_s1 + $0x18] sm:$0xff]  ;;  %v623_v20 = vld [vmem:[%s680_s6] sm:$0xff]  ;;  %v504_v27 = vld [vmem:[%s681_s3 + $0x8] sm:$0xff] }
   0x6   :  { %v92_v3 = vsel %vm90_vm0, %v72_v2, 0  ;;  %v37_v19 = vpack.c.bf16 %v31_v18, %v30_v17  ;;  %v49_v23 = vperm.slane %v623_v20, 0  ;;  %v503_v32 = vld [vmem:[%s681_s3] sm:$0xff] }
   0x7   :  { %97 = vmatpush.bf16.msra.mxu0 %v92_v3  ;;  %512 = vmatpush.bf16.msra.mxu2 %v92_v3  ;;  %v527_v43 = vpop.eup %526 }
   0x8   :  { %511 = vmatpush.bf16.msra.mxu1 %v92_v3  ;;  %v181_v52 = vmul.f32 8.0, %v527_v43  ;;  %vm185_vm3 = vweird.f32 %v527_v43 }
   0xa   :  { %v182_v62 = vsub.f32 1.0, %v181_v52 }
   0xb   :  { %98 = vmatpush.bf16.msra.mxu0 %v502_v4  ;;  %514 = vmatpush.bf16.msra.mxu2 %v502_v4 }
   0xc   :  { %513 = vmatpush.bf16.msra.mxu1 %v502_v4  ;;  %v183_v9 = vmul.f32 %v527_v43, %v182_v62 }
   0xf   :  { %99 = vmatpush.bf16.msra.mxu0 %v501_v5  ;;  %516 = vmatpush.bf16.msra.mxu2 %v501_v5 }
  0x10   :  { %515 = vmatpush.bf16.msra.mxu1 %v501_v5 }
  0x13   :  { %100 = vmatpush.bf16.msra.mxu0 %v500_v6  ;;  %518 = vmatpush.bf16.msra.mxu2 %v500_v6 }
  0x14   :  { %517 = vmatpush.bf16.msra.mxu1 %v500_v6 }
  0x17   :  { %101 = vmatpush.bf16.msra.mxu0 %v499_v7  ;;  %520 = vmatpush.bf16.msra.mxu2 %v499_v7 }
  0x18   :  { %519 = vmatpush.bf16.msra.mxu1 %v499_v7 }
  0x1a   :  { %459 = vmatmul.msk.bf16.vlgmr.msra.gmra.mxu0 %vm77_vm1, %v36_v14  ;;  %462 = vmatmul.msk.bf16.vlgmr.msra.gmra.mxu2 %vm77_vm1, %v39_v15 }
  0x1b   :  { %461 = vmatmul.msk.bf16.vlgmr.msra.gmra.mxu1 %vm77_vm1, %v38_v16 }
  0x1c   :  { %247 = vmatpush.bf16.msrb.mxu1 %v504_v27 }
  0x20   :  { %248 = vmatpush.bf16.msrb.mxu1 %v503_v32 }
  0x2a   :  { %460 = vmatmul.msk.bf16.gmra.mxu0 %vm77_vm1, %v37_v19 }
  0x97   :  { %v103_v21 = vpop.f32.mrf.mxu0 }
  0x98   :  { %v113_v22 = vpop.f32.mrf.mxu1  ;;  %v104_v25 = vadd.f32 %v103_v21, %v49_v23  ;;  %v184_v21 = vadd.f32 %v527_v43, %v183_v9 }
  0x99   :  { %v114_v31 = vadd.f32 %v113_v22, %v49_v23 }
  0x9a   :  { %v124_v33 = vsel %vm123_vm2, %v104_v25, 0.0 }
  0x9b   :  { %v125_v38 = vrot.slane %v124_v33, 4  ;;  %v152_v39 = vsel %vm123_vm2, %v114_v31, 0.0  ;;  %v186_v31 = vsel %vm185_vm3, %v527_v43, %v184_v21 }
  0x9c   :  { %v153_v47 = vrot.slane %v152_v39, 4 }
  0x9d   :  { %v118_v24 = vpop.f32.mrf.mxu2  ;;  %v126_v50 = vadd.f32 %v125_v38, %v124_v33 }
  0x9e   :  { %v119_v36 = vadd.f32 %v118_v24, %v49_v23  ;;  %v154_v58 = vadd.f32 %v153_v47, %v152_v39 }
  0x9f   :  { %v105_v26 = vpop.f32.mrf.mxu0  ;;  %v127_v59 = vrot.slane %v126_v50, 2 }
  0xa0   :  { %v106_v28 = vadd.f32 %v105_v26, %v49_v23  ;;  %v115_v29 = vpop.f32.mrf.mxu1  ;;  %v166_v44 = vsel %vm123_vm2, %v119_v36, 0.0  ;;  %v155_v4 = vrot.slane %v154_v58, 2 }
  0xa1   :  { %v116_v35 = vadd.f32 %v115_v29, %v49_v23  ;;  %v167_v53 = vrot.slane %v166_v44, 4  ;;  %v128_v6 = vadd.f32 %v127_v59, %v126_v50  ;;  %v505_v59 = vld [vmem:[%s683_s4] sm:$0xff] }
  0xa2   :  { %v131_v34 = vsel %vm123_vm2, %v106_v28, 0.0  ;;  %v156_v15 = vadd.f32 %v155_v4, %v154_v58  ;;  %v506_v58 = vld [vmem:[%s683_s4 + $0x8] sm:$0xff]  ;;  %s539_s4 = smov 48  }
  0xa3   :  { %v132_v37 = vrot.slane %v131_v34, 4  ;;  %v159_v41 = vsel %vm123_vm2, %v116_v35, 0.0  ;;  %v168_v63 = vadd.f32 %v167_v53, %v166_v44  ;;  %v129_v17 = vrot.slane %v128_v6, 1  ;;  %v643_v53 = vld [vmem:[%s682_s0] sm:$0xff]  ;;  %282 = vmatpush.bf16.msrb.mxu2 %v506_v58  ;;  %s538_s0 = smov 80  }
  0xa4   :  { %v160_v51 = vrot.slane %v159_v41, 4  ;;  %v157_v26 = vrot.slane %v156_v15, 1 }
  0xa5   :  { %v120_v40 = vpop.f32.mrf.mxu2  ;;  %v133_v45 = vadd.f32 %v132_v37, %v131_v34  ;;  %v169_v10 = vrot.slane %v168_v63, 2  ;;  %v130_v28 = vadd.f32 %v129_v17, %v128_v6 }
  0xa6   :  { %v121_v42 = vadd.f32 %v120_v40, %v49_v23  ;;  %v161_v60 = vadd.f32 %v160_v51, %v159_v41  ;;  %v158_v36 = vadd.f32 %v157_v26, %v156_v15 }
  0xa7   :  { %v108_v46 = vpop.f32.mrf.mxu0  ;;  %v134_v55 = vrot.slane %v133_v45, 2  ;;  %v170_v22 = vadd.f32 %v169_v10, %v168_v63  ;;  %v187_v38 = vmul.f32 %v186_v31, %v130_v28  ;;  %283 = vmatpush.bf16.msrb.mxu2 %v505_v59 }
  0xa8   :  { %v173_v48 = vsel %vm123_vm2, %v121_v42, 0.0  ;;  %v109_v49 = vadd.f32 %v108_v46, %v49_v23  ;;  %v162_v7 = vrot.slane %v161_v60, 2  ;;  %v191_v46 = vmul.f32 %v186_v31, %v158_v36 }
  0xa9   :  { %v174_v56 = vrot.slane %v173_v48, 4  ;;  %v135_v0 = vadd.f32 %v134_v55, %v133_v45  ;;  %v171_v32 = vrot.slane %v170_v22, 1 }
  0xaa   :  { %v138_v54 = vsel %vm123_vm2, %v109_v49, 0.0  ;;  %v163_v18 = vadd.f32 %v162_v7, %v161_v60  ;;  %v225_v60 = vperm.slane %v623_v20, 1 }
  0xab   :  { %v139_v57 = vrot.slane %v138_v54, 4  ;;  %v175_v1 = vadd.f32 %v174_v56, %v173_v48  ;;  %v136_v12 = vrot.slane %v135_v0, 1  ;;  %v172_v41 = vadd.f32 %v171_v32, %v170_v22 }
  0xac   :  { %v164_v29 = vrot.slane %v163_v18, 1 }
  0xad   :  { %v140_v61 = vadd.f32 %v139_v57, %v138_v54  ;;  %v176_v13 = vrot.slane %v175_v1, 2  ;;  %v137_v24 = vadd.f32 %v136_v12, %v135_v0  ;;  %v193_v49 = vmul.f32 %v186_v31, %v172_v41 }
  0xae   :  { %v165_v39 = vadd.f32 %v164_v29, %v163_v18 }
  0xaf   :  { %v141_v2 = vrot.slane %v140_v61, 2  ;;  %v110_v3 = vpop.f32.mrf.mxu0  ;;  %v188_v33 = vmul.f32 %v186_v31, %v137_v24 }
  0xb0   :  { %v111_v5 = vadd.f32 %v110_v3, %v49_v23  ;;  %v177_v23 = vadd.f32 %v176_v13, %v175_v1  ;;  %v192_v43 = vmul.f32 %v186_v31, %v165_v39 }
  0xb1   :  { %v142_v8 = vadd.f32 %v141_v2, %v140_v61  ;;  %v205_v45 = vsel %vm204_vm4, %v188_v33, %v187_v38  ;;  %v260_v2 = vperm.slane %v623_v20, 2  ;;  %vm430_vm4 = vcmask 130048  }
  0xb2   :  { %v145_v11 = vsel %vm123_vm2, %v111_v5, 0.0  ;;  %v178_v34 = vrot.slane %v177_v23, 1 }
  0xb3   :  { %v146_v14 = vrot.slane %v145_v11, 4  ;;  %v143_v16 = vrot.slane %v142_v8, 1 }
  0xb4   :  { %v179_v44 = vadd.f32 %v178_v34, %v177_v23 }
  0xb5   :  { %v147_v19 = vadd.f32 %v146_v14, %v145_v11  ;;  %v144_v27 = vadd.f32 %v143_v16, %v142_v8 }
  0xb6   :  { %v194_v51 = vmul.f32 %v186_v31, %v179_v44 }
  0xb7   :  { %v148_v25 = vrot.slane %v147_v19, 2  ;;  %v189_v37 = vmul.f32 %v186_v31, %v144_v27 }
  0xb9   :  { %v149_v30 = vadd.f32 %v148_v25, %v147_v19  ;;  %v207_v47 = vsel %vm206_vm5, %v189_v37, %v205_v45  ;;  %vm432_vm5 = vcmask 392192  }
  0xbb   :  { %v150_v35 = vrot.slane %v149_v30, 1 }
  0xbd   :  { %v151_v40 = vadd.f32 %v150_v35, %v149_v30 }
  0xbf   :  { %v190_v42 = vmul.f32 %v186_v31, %v151_v40 }
  0xc1   :  { %v209_v48 = vsel %vm208_vm6, %v190_v42, %v207_v47  ;;  %vm434_vm6 = vcmask 654336  }
  0xc2   :  { %v211_v50 = vsel %vm210_vm7, %v191_v46, %v209_v48  ;;  %vm436_vm7 = vcmask 916480  }
  0xc3   :  { %v213_v52 = vsel %vm212_vm8, %v192_v43, %v211_v50 }
  0xc4   :  { %v215_v54 = vsel %vm214_vm9, %v193_v49, %v213_v52  ;;  %v540_v49 = vmov 64.0  }
  0xc5   :  { %v217_v55 = vsel %vm216_vm10, %v194_v51, %v215_v54  ;;  %v510_v54 = vld [vmem:[%s684_s5 + $0x18] sm:$0xff] }
  0xc6   :  { %419 = vrot.lane.b32.xlu1 %v217_v55, %s537_s8  ;;  %v219_v56 = vadd.f32 %v217_v55, %v643_v53  ;;  %410 = vmatpush.bf16.msra.mxu3 %v510_v54 }
  0xc8   :  { %v220_v57 = vpack.c.bf16 %v219_v56, %v219_v56  ;;  %v509_v56 = vld [vmem:[%s684_s5 + $0x10] sm:$0xff] }
  0xca   :  { %471 = vmatmul.msk.bf16.vlgmr.msrb.gmra.mxu1 %vm123_vm2, %v220_v57  ;;  %411 = vmatpush.bf16.msra.mxu3 %v509_v56 }
  0xce   :  { %423 = vrot.lane.b32.xlu1 %v643_v53, %s539_s4  ;;  %v508_v53 = vld [vmem:[%s684_s5 + $0x8] sm:$0xff] }
  0xcf   :  { %412 = vmatpush.bf16.msra.mxu3 %v508_v53 }
 0x147   :  { %v250_v61 = vpop.f32.mrf.mxu1 }
 0x148   :  { %v251_v62 = vadd.f32 %v250_v61, %v225_v60  ;;  %v507_v60 = vld [vmem:[%s684_s5] sm:$0xff] }
 0x149   :  { %413 = vmatpush.bf16.msra.mxu3 %v507_v60 }
 0x14a   :  { %528 = vtanh.f32 %v251_v62 }
 0x14f   :  { %v252_v63 = vpop.f32.mrf.mxu1 }
 0x150   :  { %v529_v0 = vpop.eup %528 }
 0x151   :  { %427 = vrot.lane.b32.xlu2 %v529_v0, %s538_s0  ;;  %v255_v1 = vpack.c.bf16 %v529_v0, %v529_v0 }
 0x153   :  { %480 = vmatmul.msk.bf16.vlgmr.msrb.gmra.mxu2 %vm123_vm2, %v255_v1 }
 0x1d6   :  { %v285_v3 = vpop.f32.mrf.mxu2 }
 0x1d7   :  { %v286_v4 = vadd.f32 %v285_v3, %v260_v2 }
 0x1d9   :  { %v290_v5 = vmul.f32 0.70710677, %v286_v4  ;;  %v289_v44 = vmul.f32 0.5, %v286_v4 }
 0x1db   :  { %v291_v6 = vmul.f32 %v290_v5, %v290_v5 }
 0x1dd   :  { %v292_v7 = vmin.f32 %v291_v6, 16.0 }
 0x1de   :  { %v287_v8 = vpop.f32.mrf.mxu2 }
 0x1df   :  { %v293_v9 = vmul.f32 2.1237322e-06, %v292_v7  ;;  %v304_v10 = vmul.f32 3.8918573e-05, %v292_v7 }
 0x1e1   :  { %v294_v11 = vadd.f32 0.00028619796, %v293_v9  ;;  %v305_v12 = vadd.f32 0.001143296, %v304_v10  ;;  %v365_v10 = vperm.slane %v623_v20, 3 }
 0x1e3   :  { %v295_v13 = vmul.f32 %v294_v11, %v292_v7  ;;  %v306_v14 = vmul.f32 %v305_v12, %v292_v7 }
 0x1e5   :  { %v307_v15 = vadd.f32 0.014752088, %v306_v14  ;;  %v296_v16 = vadd.f32 0.0036580483, %v295_v13  ;;  %v367_v13 = vperm.slane %v623_v20, 4 }
 0x1e7   :  { %v308_v17 = vmul.f32 %v307_v15, %v292_v7  ;;  %v297_v19 = vmul.f32 %v296_v16, %v292_v7 }
 0x1e9   :  { %v309_v18 = vadd.f32 0.112945676, %v308_v17  ;;  %v298_v24 = vadd.f32 0.05243302, %v297_v19  ;;  %v420_v17 = vpop.permute.xlu1 %419 }
 0x1eb   :  { %v310_v21 = vmul.f32 %v309_v18, %v292_v7  ;;  %v299_v26 = vmul.f32 %v298_v24, %v292_v7  ;;  %v378_v18 = vperm.slane %v623_v20, 5 }
 0x1ed   :  { %v311_v22 = vadd.f32 0.4994258, %v310_v21  ;;  %v300_v27 = vadd.f32 0.18741608, %v299_v26 }
 0x1ef   :  { %v312_v23 = vmul.f32 %v311_v22, %v292_v7  ;;  %v301_v29 = vmul.f32 %v300_v27, %v292_v7 }
 0x1f1   :  { %v313_v25 = vadd.f32 1.0, %v312_v23  ;;  %v302_v33 = vadd.f32 1.1283791, %v301_v29  ;;  %v424_v22 = vpop.permute.xlu1 %423  ;;  %v428_v23 = vpop.permute.xlu2 %427 }
 0x1f3   :  { %530 = vrcp.f32 %v313_v25  ;;  %v325_v32 = vand.u32 2147483648, %v313_v25  ;;  %v323_v35 = vand.u32 2147483647, %v313_v25  ;;  %vm319_vm12 = vweird.f32 %v313_v25 }
 0x1f4   :  { %v303_v38 = vmul.f32 %v302_v33, %v290_v5  ;;  %532 = vrcp.f32 %v540_v49 }
 0x1f5   :  { %v326_v37 = vor.u32 1.1754944e-38, %v325_v32  ;;  %vm324_vm14 = vcmp.eq.f32.partialorder %v323_v35, 8.507059e+37 }
 0x1f9   :  { %v531_v28 = vpop.eup %530 }
 0x1fa   :  { %v315_v30 = vmul.f32 %v531_v28, %v313_v25  ;;  %vm320_vm11 = vweird.f32 %v531_v28  ;;  %v533_v50 = vpop.eup %532 }
 0x1fb   :  { %vm321_vm13 = vmor %vm319_vm12, %vm320_vm11  ;;  %v338_v51 = vmul.f32 64.0, %v533_v50  ;;  %vm342_vm0 = vweird.f32 %v533_v50 }
 0x1fc   :  { %v316_v31 = vsub.f32 1.0, %v315_v30 }
 0x1fd   :  { %v339_v52 = vsub.f32 1.0, %v338_v51 }
 0x1fe   :  { %v317_v34 = vmul.f32 %v531_v28, %v316_v31 }
 0x1ff   :  { %v340_v55 = vmul.f32 %v533_v50, %v339_v52 }
 0x200   :  { %v318_v36 = vadd.f32 %v531_v28, %v317_v34 }
 0x201   :  { %v341_v57 = vadd.f32 %v533_v50, %v340_v55 }
 0x202   :  { %v322_v39 = vsel %vm321_vm13, %v531_v28, %v318_v36 }
 0x203   :  { %v327_v40 = vsel %vm324_vm14, %v326_v37, %v322_v39  ;;  %v343_v59 = vsel %vm342_vm0, %v533_v50, %v341_v57 }
 0x204   :  { %v328_v41 = vmul.f32 %v327_v40, %v303_v38 }
 0x206   :  { %v481_v42 = vclamps-f32 %v328_v41, 1.0 }
 0x208   :  { %v331_v45 = vadd.f32 1.0, %v481_v42 }
 0x20a   :  { %v332_v46 = vmul.f32 %v331_v45, %v289_v44 }
 0x20c   :  { %v334_v47 = vsel %vm333_vm15, %v332_v46, 0.0  ;;  %v345_v43 = vmul.f32 %v332_v46, %v332_v46 }
 0x20d   :  { %335 = vadd.xlane.f32.xlu0 %v334_v47 }
 0x20e   :  { %v346_v48 = vsel %vm333_vm15, %v345_v43, 0.0 }
 0x215   :  { %347 = vadd.xlane.f32.xlu0 %v346_v48 }
 0x280   :  { %v336_v58 = vpop.xlane.xlu0 %335 }
 0x281   :  { %v344_v61 = vmul.f32 %v343_v59, %v336_v58 }
 0x283   :  { %v350_v63 = vmul.f32 %v344_v61, %v344_v61  ;;  %v352_v9 = vsub.f32 %v332_v46, %v344_v61 }
 0x288   :  { %v348_v62 = vpop.xlane.xlu0 %347 }
 0x289   :  { %v349_v0 = vmul.f32 %v348_v62, %v343_v59 }
 0x28b   :  { %v351_v1 = vsub.f32 %v349_v0, %v350_v63 }
 0x28d   :  { %v353_v2 = vadd.f32 1e-12, %v351_v1 }
 0x28f   :  { %534 = vrsqrt.f32 %v353_v2  ;;  %vm360_vm2 = vweird.f32 %v353_v2 }
 0x295   :  { %v535_v3 = vpop.eup %534 }
 0x296   :  { %v355_v4 = vmul.f32 %v535_v3, %v353_v2  ;;  %vm361_vm1 = vweird.f32 %v535_v3 }
 0x297   :  { %vm362_vm3 = vmor %vm360_vm2, %vm361_vm1 }
 0x298   :  { %v356_v5 = vmul.f32 %v535_v3, %v355_v4 }
 0x29a   :  { %v357_v6 = vmul.f32 0.5, %v356_v5 }
 0x29c   :  { %v358_v7 = vsub.f32 1.5, %v357_v6 }
 0x29e   :  { %v359_v8 = vmul.f32 %v535_v3, %v358_v7 }
 0x2a0   :  { %v363_v11 = vsel %vm362_vm3, %v535_v3, %v359_v8 }
 0x2a1   :  { %v364_v12 = vmul.f32 %v363_v11, %v352_v9 }
 0x2a3   :  { %v366_v14 = vmul.f32 %v365_v10, %v364_v12 }
 0x2a5   :  { %v368_v15 = vadd.f32 %v367_v13, %v366_v14 }
 0x2a7   :  { %v369_v16 = vpack.c.bf16 %v368_v15, %v368_v15 }
 0x2a9   :  { %498 = vmatmul.msk.bf16.vlgmr.msra.gmra.mxu3 %vm333_vm15, %v369_v16 }
 0x32c   :  { %v415_v19 = vpop.f32.mrf.mxu3 }
 0x32d   :  { %v416_v21 = vadd.f32 %v415_v19, %v378_v18 }
 0x32f   :  { %v431_v24 = vsel %vm430_vm4, %v416_v21, %v420_v17 }
 0x330   :  { %v433_v25 = vsel %vm432_vm5, %v431_v24, %v424_v22 }
 0x331   :  { %v435_v26 = vsel %vm434_vm6, %v433_v25, %v428_v23 }
 0x332   :  { %v437_v27 = vsel %vm436_vm7, %v435_v26, 0.0 }
 0x333   :  { %438 = vst [vmem:[%s685_s7] sm:$0xff] %v437_v27 }
 0x334   :  { %v417_v28 = vpop.f32.mrf.mxu3 }

</bundles_post_ra>
